<compile_context>
chip_gen: v7x
topology: tpu7x:2x2x1
jax: 0.10.0
libtpu: 0.0.40
codegen_flags: <defaults>
</compile_context>

<pallas_src>
import functools

import jax
import jax.numpy as jnp
from jax.experimental import pallas as pl
from jax.experimental.pallas import tpu as pltpu

HIDDEN = 20
NUM_LAYERS = 4          # 1 input layer + (num_layers - 1) hidden layers + output layer
LANE = 128              # padded feature width (sublane axis of the activations)
OUT_PAD = 8             # padded output rows (first 3 are the real S,I,R outputs)
MAX_TN = 2048           # max batch (lane) tile per grid step


def _round_up(x, m):
    return ((x + m - 1) // m) * m


def _ceil_div(a, b):
    return -(-a // b)


# ----------------------------- Pallas kernel --------------------------------

def _sirnet_kernel(t_ref, w0_ref, b0_ref, w_ref, b_ref, wo_ref, bo_ref, o_ref,
                   *, num_hidden):
    """Full MLP forward for one (1, TN) tile of inputs, feature-major.

    t_ref : (1, TN)        input times (batch on lanes)
    w0_ref: (LANE, 1)      Linear(1,H) weight column (padded)
    b0_ref: (LANE, 1)      Linear(1,H) bias (padded)
    w_ref : (nh, LANE, LANE)  hidden Linear(H,H) weights (padded, NOT transposed)
    b_ref : (nh, LANE, 1)     hidden biases (padded)
    wo_ref: (OUT_PAD, LANE)   output Linear(H,3) weight (padded)
    bo_ref: (OUT_PAD, 1)      output bias (padded)
    o_ref : (OUT_PAD, TN)     lane-dense output tile
    """
    t = t_ref[...]                                                  # (1, TN)

    # Layer 0: Linear(1, H) + tanh as a broadcast multiply (VPU + EUP, no MXU).
    x = jnp.tanh(w0_ref[...] * t + b0_ref[...])                     # (LANE, TN)

    # Hidden layers: Linear(H, H) + tanh on the MXU (f32 accumulation).
    for l in range(num_hidden):
        x = jnp.tanh(
            jnp.dot(w_ref[l], x, preferred_element_type=jnp.float32)
            + b_ref[l])                                              # (LANE, TN)

    # Output layer: Linear(H, 3), no activation.  (OUT_PAD, TN) — lane-dense store.
    y = jnp.dot(wo_ref[...], x, preferred_element_type=jnp.float32) + bo_ref[...]
    o_ref[...] = y.astype(o_ref.dtype)


# ------------------------------ parameter packing ----------------------------

def pack_sirnet_params(params):
    """One-time packing of torch-style (W(out,in), b(out,)) params into
    feature-major, 128-padded arrays.  Call once, reuse across forwards."""
    (w0, b0) = params[0]
    hidden = params[1:-1]
    (wo, bo) = params[-1]

    h = w0.shape[0]
    w0_col = jnp.zeros((LANE, 1), jnp.float32).at[:h, 0].set(w0[:, 0])
    b0_col = jnp.zeros((LANE, 1), jnp.float32).at[:h, 0].set(b0)

    nh = len(hidden)
    w_stack = jnp.zeros((nh, LANE, LANE), jnp.float32)
    b_stack = jnp.zeros((nh, LANE, 1), jnp.float32)
    for l, (w, b) in enumerate(hidden):
        out_f, in_f = w.shape
        w_stack = w_stack.at[l, :out_f, :in_f].set(w)   # W @ x → no transpose
        b_stack = b_stack.at[l, :out_f, 0].set(b)

    out_f, in_f = wo.shape
    wo_pad = jnp.zeros((OUT_PAD, LANE), jnp.float32).at[:out_f, :in_f].set(wo)
    bo_pad = jnp.zeros((OUT_PAD, 1), jnp.float32).at[:out_f, 0].set(bo)

    return dict(w0=w0_col, b0=b0_col, w=w_stack, b=b_stack, wo=wo_pad, bo=bo_pad)


# --------------------------------- forward -----------------------------------

@functools.partial(jax.jit, static_argnames=("tn",))
def sirnet_forward(t, packed, tn=None):
    """t: (N, 1) float32.  packed: output of pack_sirnet_params.
    Returns (N, 3) float32 (== SIRNet.forward(t))."""
    n = t.shape[0]

    if tn is None:
        # Target >= 2 grid steps so the 'parallel' batch axis can shard across
        # both v7x TensorCores; cap at MAX_TN (fits v5e's 16 MiB scoped VMEM).
        tn = min(MAX_TN, _round_up(max(_ceil_div(n, 2), 1), LANE))
    else:
        tn = max(LANE, _round_up(tn, LANE))
    num_tiles = max(2, _ceil_div(n, tn))
    n_pad = num_tiles * tn

    # Lane-dense input row: (1, n_pad).
    t_row = jnp.zeros((1, n_pad), jnp.float32).at[0, :n].set(
        t.astype(jnp.float32)[:, 0])

    num_hidden = packed["w"].shape[0]

    out_pad = pl.pallas_call(
        functools.partial(_sirnet_kernel, num_hidden=num_hidden),
        out_shape=jax.ShapeDtypeStruct((OUT_PAD, n_pad), jnp.float32),
        grid_spec=pl.GridSpec(
            grid=(num_tiles,),
            in_specs=[
                pl.BlockSpec((1, tn), lambda i: (0, i)),                     # t row tile
                pl.BlockSpec((LANE, 1), lambda i: (0, 0)),                   # w0 column
                pl.BlockSpec((LANE, 1), lambda i: (0, 0)),                   # b0 column
                pl.BlockSpec((num_hidden, LANE, LANE), lambda i: (0, 0, 0)), # W stack
                pl.BlockSpec((num_hidden, LANE, 1), lambda i: (0, 0, 0)),    # b stack
                pl.BlockSpec((OUT_PAD, LANE), lambda i: (0, 0)),             # W out
                pl.BlockSpec((OUT_PAD, 1), lambda i: (0, 0)),                # b out
            ],
            out_specs=pl.BlockSpec((OUT_PAD, tn), lambda i: (0, i)),
        ),
        compiler_params=pltpu.CompilerParams(
            dimension_semantics=("parallel",)),
    )(t_row, packed["w0"], packed["b0"], packed["w"], packed["b"],
      packed["wo"], packed["bo"])

    # Cheap (3, n) sublane slice + transpose in the wrapper.
    return out_pad[:3, :n].T


# ------------------------- deterministic parameter init ---------------------

def init_sirnet_params(key, hidden_neurons=HIDDEN, num_layers=NUM_LAYERS):
    """Xavier-uniform (gain = 5/3 for tanh) weights, zero biases.
    Deterministic via the provided key (synthetic init, not a checkpoint)."""
    gain = 5.0 / 3.0
    dims = [1] + [hidden_neurons] * num_layers + [3]
    params = []
    for i in range(len(dims) - 1):
        fan_in, fan_out = dims[i], dims[i + 1]
        key, sub = jax.random.split(key)
        bound = gain * jnp.sqrt(6.0 / (fan_in + fan_out))
        w = jax.random.uniform(sub, (fan_out, fan_in), jnp.float32, -bound, bound)
        b = jnp.zeros((fan_out,), jnp.float32)
        params.append((w, b))
    return params


def sirnet_reference(t, params):
    """Pure-JAX reference of the PyTorch forward."""
    x = t.astype(jnp.float32)
    for idx, (w, b) in enumerate(params):
        x = x @ w.T + b
        if idx < len(params) - 1:
            x = jnp.tanh(x)
    return x


# TODO(synk): the inverse-mode beta/gamma sigmoid properties are scalar
# parameter transforms outside forward(); not implemented as a kernel.

# ------------------------------------ main ----------------------------------

if __name__ == "__main__":
    key = jax.random.PRNGKey(0)
    pkey, tkey = jax.random.split(key)

    params = init_sirnet_params(pkey)
    packed = pack_sirnet_params(params)   # one-time packing (hoisted out of forward)

    # Small input: N = 16 time points, shape (N, 1) like the PINN's `t`.
    N = 16
    t = jax.random.uniform(tkey, (N, 1), jnp.float32, 0.0, 10.0)

    out = jax.block_until_ready(sirnet_forward(t, packed))
    ref = sirnet_reference(t, params)
    assert out.shape == (N, 3), out.shape
    assert jnp.allclose(out, ref, atol=1e-5, rtol=1e-5), (
        float(jnp.max(jnp.abs(out - ref))))

    # Multi-tile path (ragged batch, grid > 2) to exercise padding + pipelining.
    N2 = 1037
    t2 = jax.random.uniform(jax.random.PRNGKey(1), (N2, 1), jnp.float32, 0.0, 10.0)
    out2 = jax.block_until_ready(sirnet_forward(t2, packed, tn=256))
    ref2 = sirnet_reference(t2, params)
    assert out2.shape == (N2, 3), out2.shape
    assert jnp.allclose(out2, ref2, atol=1e-5, rtol=1e-5), (
        float(jnp.max(jnp.abs(out2 - ref2))))

    print("KERNEL_OK")
</pallas_src>

<mosaic_0001>
module attributes {stable_mosaic.version = 11 : i64} {
  func.func @_sirnet_kernel(%arg0: i32, %arg1: memref<1x128xf32, #tpu.memory_space<vmem>>, %arg2: memref<128x1xf32, #tpu.memory_space<vmem>>, %arg3: memref<128x1xf32, #tpu.memory_space<vmem>>, %arg4: memref<3x128x128xf32, #tpu.memory_space<vmem>>, %arg5: memref<3x128x1xf32, #tpu.memory_space<vmem>>, %arg6: memref<8x128xf32, #tpu.memory_space<vmem>>, %arg7: memref<8x1xf32, #tpu.memory_space<vmem>>, %arg8: memref<8x128xf32, #tpu.memory_space<vmem>>) attributes {dimension_semantics = [#tpu.dimension_semantics<parallel>], iteration_bounds = array<i64: 2>, scalar_prefetch = 0 : i64, scratch_operands = 0 : i64, tpu.core_type = #tpu.core_type<tc>, window_params = [{transform_indices = @transform_0, window_bounds = array<i64: 1, 128>}, {pipeline_mode = #tpu.pipeline_mode<synchronous>, transform_indices = @transform_1, window_bounds = array<i64: 128, 1>}, {pipeline_mode = #tpu.pipeline_mode<synchronous>, transform_indices = @transform_2, window_bounds = array<i64: 128, 1>}, {pipeline_mode = #tpu.pipeline_mode<synchronous>, transform_indices = @transform_3, window_bounds = array<i64: 3, 128, 128>}, {pipeline_mode = #tpu.pipeline_mode<synchronous>, transform_indices = @transform_4, window_bounds = array<i64: 3, 128, 1>}, {pipeline_mode = #tpu.pipeline_mode<synchronous>, transform_indices = @transform_5, window_bounds = array<i64: 8, 128>}, {pipeline_mode = #tpu.pipeline_mode<synchronous>, transform_indices = @transform_6, window_bounds = array<i64: 8, 1>}, {transform_indices = @transform_7, window_bounds = array<i64: 8, 128>}]} {
    %c0 = arith.constant 0 : index
    %c0_0 = arith.constant 0 : index
    %0 = vector.load %arg1[%c0, %c0_0] : memref<1x128xf32, #tpu.memory_space<vmem>>, vector<1x128xf32>
    %c0_1 = arith.constant 0 : index
    %c0_2 = arith.constant 0 : index
    %1 = vector.load %arg2[%c0_1, %c0_2] : memref<128x1xf32, #tpu.memory_space<vmem>>, vector<128x1xf32>
    %2 = vector.broadcast %1 : vector<128x1xf32> to vector<128x128xf32>
    %3 = vector.broadcast %0 : vector<1x128xf32> to vector<128x128xf32>
    %4 = arith.mulf %2, %3 : vector<128x128xf32>
    %c0_3 = arith.constant 0 : index
    %c0_4 = arith.constant 0 : index
    %5 = vector.load %arg3[%c0_3, %c0_4] : memref<128x1xf32, #tpu.memory_space<vmem>>, vector<128x1xf32>
    %6 = vector.broadcast %5 : vector<128x1xf32> to vector<128x128xf32>
    %7 = arith.addf %4, %6 : vector<128x128xf32>
    %8 = math.tanh %7 : vector<128x128xf32>
    %c0_5 = arith.constant 0 : index
    %c0_6 = arith.constant 0 : index
    %c0_7 = arith.constant 0 : index
    %9 = vector.load %arg4[%c0_5, %c0_6, %c0_7] : memref<3x128x128xf32, #tpu.memory_space<vmem>>, vector<1x128x128xf32>
    %10 = vector.shape_cast %9 : vector<1x128x128xf32> to vector<128x128xf32>
    %cst = arith.constant dense<0.000000e+00> : vector<128x128xf32>
    %11 = tpu.matmul %10, %8, %cst {dimension_numbers = #tpu.dot_dimension_numbers<[1], [0], [0], [1], [0, 0, 1, 1], [], []>} : vector<128x128xf32>, vector<128x128xf32>, vector<128x128xf32> -> vector<128x128xf32>
    %c0_8 = arith.constant 0 : index
    %c0_9 = arith.constant 0 : index
    %c0_10 = arith.constant 0 : index
    %12 = vector.load %arg5[%c0_8, %c0_9, %c0_10] : memref<3x128x1xf32, #tpu.memory_space<vmem>>, vector<1x128x1xf32>
    %13 = vector.shape_cast %12 : vector<1x128x1xf32> to vector<128x1xf32>
    %14 = vector.broadcast %13 : vector<128x1xf32> to vector<128x128xf32>
    %15 = arith.addf %11, %14 : vector<128x128xf32>
    %16 = math.tanh %15 : vector<128x128xf32>
    %c1 = arith.constant 1 : index
    %c0_11 = arith.constant 0 : index
    %c0_12 = arith.constant 0 : index
    %17 = vector.load %arg4[%c1, %c0_11, %c0_12] : memref<3x128x128xf32, #tpu.memory_space<vmem>>, vector<1x128x128xf32>
    %18 = vector.shape_cast %17 : vector<1x128x128xf32> to vector<128x128xf32>
    %cst_13 = arith.constant dense<0.000000e+00> : vector<128x128xf32>
    %19 = tpu.matmul %18, %16, %cst_13 {dimension_numbers = #tpu.dot_dimension_numbers<[1], [0], [0], [1], [0, 0, 1, 1], [], []>} : vector<128x128xf32>, vector<128x128xf32>, vector<128x128xf32> -> vector<128x128xf32>
    %c1_14 = arith.constant 1 : index
    %c0_15 = arith.constant 0 : index
    %c0_16 = arith.constant 0 : index
    %20 = vector.load %arg5[%c1_14, %c0_15, %c0_16] : memref<3x128x1xf32, #tpu.memory_space<vmem>>, vector<1x128x1xf32>
    %21 = vector.shape_cast %20 : vector<1x128x1xf32> to vector<128x1xf32>
    %22 = vector.broadcast %21 : vector<128x1xf32> to vector<128x128xf32>
    %23 = arith.addf %19, %22 : vector<128x128xf32>
    %24 = math.tanh %23 : vector<128x128xf32>
    %c2 = arith.constant 2 : index
    %c0_17 = arith.constant 0 : index
    %c0_18 = arith.constant 0 : index
    %25 = vector.load %arg4[%c2, %c0_17, %c0_18] : memref<3x128x128xf32, #tpu.memory_space<vmem>>, vector<1x128x128xf32>
    %26 = vector.shape_cast %25 : vector<1x128x128xf32> to vector<128x128xf32>
    %cst_19 = arith.constant dense<0.000000e+00> : vector<128x128xf32>
    %27 = tpu.matmul %26, %24, %cst_19 {dimension_numbers = #tpu.dot_dimension_numbers<[1], [0], [0], [1], [0, 0, 1, 1], [], []>} : vector<128x128xf32>, vector<128x128xf32>, vector<128x128xf32> -> vector<128x128xf32>
    %c2_20 = arith.constant 2 : index
    %c0_21 = arith.constant 0 : index
    %c0_22 = arith.constant 0 : index
    %28 = vector.load %arg5[%c2_20, %c0_21, %c0_22] : memref<3x128x1xf32, #tpu.memory_space<vmem>>, vector<1x128x1xf32>
    %29 = vector.shape_cast %28 : vector<1x128x1xf32> to vector<128x1xf32>
    %30 = vector.broadcast %29 : vector<128x1xf32> to vector<128x128xf32>
    %31 = arith.addf %27, %30 : vector<128x128xf32>
    %32 = math.tanh %31 : vector<128x128xf32>
    %c0_23 = arith.constant 0 : index
    %c0_24 = arith.constant 0 : index
    %33 = vector.load %arg6[%c0_23, %c0_24] : memref<8x128xf32, #tpu.memory_space<vmem>>, vector<8x128xf32>
    %cst_25 = arith.constant dense<0.000000e+00> : vector<8x128xf32>
    %34 = tpu.matmul %33, %32, %cst_25 {dimension_numbers = #tpu.dot_dimension_numbers<[1], [0], [0], [1], [0, 0, 1, 1], [], []>} : vector<8x128xf32>, vector<128x128xf32>, vector<8x128xf32> -> vector<8x128xf32>
    %c0_26 = arith.constant 0 : index
    %c0_27 = arith.constant 0 : index
    %35 = vector.load %arg7[%c0_26, %c0_27] : memref<8x1xf32, #tpu.memory_space<vmem>>, vector<8x1xf32>
    %36 = vector.broadcast %35 : vector<8x1xf32> to vector<8x128xf32>
    %37 = arith.addf %34, %36 : vector<8x128xf32>
    %c0_28 = arith.constant 0 : index
    %c0_29 = arith.constant 0 : index
    %38 = vector.load %arg8[%c0_28, %c0_29] : memref<8x128xf32, #tpu.memory_space<vmem>>, vector<8x128xf32>
    tpu.vector_store %arg8[%c0_28, %c0_29], %37 {strides = array<i32>} : memref<8x128xf32, #tpu.memory_space<vmem>>, vector<8x128xf32>,
    return
  }
  func.func @transform_0(%arg0: i32) -> (i32, i32) {
    %c0_i32 = arith.constant 0 : i32
    %c0_i32_0 = arith.constant 0 : i32
    return %c0_i32, %arg0 : i32, i32
  }
  func.func @transform_1(%arg0: i32) -> (i32, i32) {
    %c0_i32 = arith.constant 0 : i32
    %c0_i32_0 = arith.constant 0 : i32
    %c0_i32_1 = arith.constant 0 : i32
    return %c0_i32, %c0_i32_0 : i32, i32
  }
  func.func @transform_2(%arg0: i32) -> (i32, i32) {
    %c0_i32 = arith.constant 0 : i32
    %c0_i32_0 = arith.constant 0 : i32
    %c0_i32_1 = arith.constant 0 : i32
    return %c0_i32, %c0_i32_0 : i32, i32
  }
  func.func @transform_3(%arg0: i32) -> (i32, i32, i32) {
    %c0_i32 = arith.constant 0 : i32
    %c0_i32_0 = arith.constant 0 : i32
    %c0_i32_1 = arith.constant 0 : i32
    %c0_i32_2 = arith.constant 0 : i32
    return %c0_i32, %c0_i32_0, %c0_i32_1 : i32, i32, i32
  }
  func.func @transform_4(%arg0: i32) -> (i32, i32, i32) {
    %c0_i32 = arith.constant 0 : i32
    %c0_i32_0 = arith.constant 0 : i32
    %c0_i32_1 = arith.constant 0 : i32
    %c0_i32_2 = arith.constant 0 : i32
    return %c0_i32, %c0_i32_0, %c0_i32_1 : i32, i32, i32
  }
  func.func @transform_5(%arg0: i32) -> (i32, i32) {
    %c0_i32 = arith.constant 0 : i32
    %c0_i32_0 = arith.constant 0 : i32
    %c0_i32_1 = arith.constant 0 : i32
    return %c0_i32, %c0_i32_0 : i32, i32
  }
  func.func @transform_6(%arg0: i32) -> (i32, i32) {
    %c0_i32 = arith.constant 0 : i32
    %c0_i32_0 = arith.constant 0 : i32
    %c0_i32_1 = arith.constant 0 : i32
    return %c0_i32, %c0_i32_0 : i32, i32
  }
  func.func @transform_7(%arg0: i32) -> (i32, i32) {
    %c0_i32 = arith.constant 0 : i32
    %c0_i32_0 = arith.constant 0 : i32
    return %c0_i32, %arg0 : i32, i32
  }
}

</mosaic_0001>

<bundles_post_ra>
// kernel: sirnet_forward.1
= control target key start
LH: loop header
LB: loop body
LE: loop exit
PB: predicated region body
PF: predicated region fallthrough
CT: control target
= control target key end

     0   :  { %s2172_s24 = smov 0   ;;  %s2613_s0 = inlined_call_operand.vmem [shape: f32[1,256], index: 0, kind: input, shape index: {}]   ;;  %s2614_s1 = inlined_call_operand.vmem [shape: f32[128,1], index: 1, kind: input, shape index: {}]   ;;  %s2615_s2 = inlined_call_operand.vmem [shape: f32[128,1], index: 2, kind: input, shape index: {}]   ;;  %s2616_s3 = inlined_call_operand.vmem [shape: f32[3,128,128], index: 3, kind: input, shape index: {}]   ;;  %s2617_s4 = inlined_call_operand.vmem [shape: f32[3,128,1], index: 4, kind: input, shape index: {}]   ;;  %s2618_s5 = inlined_call_operand.vmem [shape: f32[8,128], index: 5, kind: input, shape index: {}]   ;;  %s2619_s6 = inlined_call_operand.vmem [shape: f32[8,1], index: 6, kind: input, shape index: {}]   ;;  %s2620_s7 = inlined_call_operand.vmem [shape: f32[8,256], index: 7, kind: output, shape index: {}]  }
   0x1 LB: > { %s1469_s25 = sadd.s32 4294967295, %s2126_s24   ;;  %p1473_p0 = scmp.ge.s32.totalorder %s2126_s24, 1  ;;  %s2126_s24 = sphi %s2172_s24, %s17_s24  }
   0x2   : > { %p235_p1 = scmp.lt.s32.totalorder %s2126_s24, 3 }
   0x4   : > { %p236_p2 = pnand %p1473_p0, %p235_p1 }
   0x5   : > { %v390_v0 = vld [vmem:[%s2615_s2] sm:$0xff] (!%p236_p2)  ;;  %v2128_v2 = vmov (!%p236_p2), 0   ;;  %v391_v3 = vld [vmem:[%s2615_s2 + $0x8] sm:$0xff] (!%p236_p2)  ;;  %v275_v5 = vld [vmem:[%s2614_s1 + $0x18] sm:$0xff] (!%p236_p2)  ;;  %p264_p3 = scmp.lt.s32.totalorder (!%p236_p2), %s1469_s25, 1  ;;  %vm2130_vm0 = vmmov (!%p236_p2), 0  }
   0x6   : > { %239 = sbr.rel (%p236_p2) target bundleno = 1209 (0x4b9), region = 48  ;;  %v272_v1 = vld [vmem:[%s2614_s1] sm:$0xff] (!%p236_p2)  ;;  %1991 = vset.pattern.permute.xlu1 (!%p236_p2), %v2128_v2  ;;  %1990 = vset.pattern.permute.xlu0 (!%p236_p2), %v2128_v2  ;;  %v273_v4 = vld [vmem:[%s2614_s1 + $0x8] sm:$0xff] (!%p236_p2)  ;;  %v274_v6 = vld [vmem:[%s2614_s1 + $0x10] sm:$0xff] (!%p236_p2) }
   0x7   : > { %408 = vperm.xlu1 (!%p236_p2), %1991, %v390_v0   ;;  %290 = vperm.xlu0 (!%p236_p2), %1990, %v272_v1   ;;  %v393_v7 = vld [vmem:[%s2615_s2 + $0x18] sm:$0xff] (!%p236_p2)  ;;  %v392_v8 = vld [vmem:[%s2615_s2 + $0x10] sm:$0xff] (!%p236_p2)  ;;  %v277_v9 = vld [vmem:[%s2614_s1 + $0x28] sm:$0xff] (!%p236_p2) }
   0x8   : > { %v276_v10 = vld [vmem:[%s2614_s1 + $0x20] sm:$0xff] (!%p236_p2)  ;;  %v395_v11 = vld [vmem:[%s2615_s2 + $0x28] sm:$0xff] (!%p236_p2)  ;;  %v279_v13 = vld [vmem:[%s2614_s1 + $0x38] sm:$0xff] (!%p236_p2) }
   0x9   : > { %v394_v12 = vld [vmem:[%s2615_s2 + $0x20] sm:$0xff] (!%p236_p2)  ;;  %v278_v14 = vld [vmem:[%s2614_s1 + $0x30] sm:$0xff] (!%p236_p2)  ;;  %v397_v15 = vld [vmem:[%s2615_s2 + $0x38] sm:$0xff] (!%p236_p2) }
   0xa   : > { %v396_v16 = vld [vmem:[%s2615_s2 + $0x30] sm:$0xff] (!%p236_p2)  ;;  %v281_v17 = vld [vmem:[%s2614_s1 + $0x48] sm:$0xff] (!%p236_p2)  ;;  %v280_v18 = vld [vmem:[%s2614_s1 + $0x40] sm:$0xff] (!%p236_p2) }
   0xb   : > { %413 = vperm.xlu1 (!%p236_p2), %1991, %v391_v3   ;;  %295 = vperm.xlu0 (!%p236_p2), %1990, %v273_v4   ;;  %v399_v19 = vld [vmem:[%s2615_s2 + $0x48] sm:$0xff] (!%p236_p2)  ;;  %v398_v20 = vld [vmem:[%s2615_s2 + $0x40] sm:$0xff] (!%p236_p2)  ;;  %v283_v21 = vld [vmem:[%s2614_s1 + $0x58] sm:$0xff] (!%p236_p2) }
   0xc   : > { %v282_v22 = vld [vmem:[%s2614_s1 + $0x50] sm:$0xff] (!%p236_p2)  ;;  %v401_v23 = vld [vmem:[%s2615_s2 + $0x58] sm:$0xff] (!%p236_p2)  ;;  %v285_v25 = vld [vmem:[%s2614_s1 + $0x68] sm:$0xff] (!%p236_p2) }
   0xd   : > { %v400_v24 = vld [vmem:[%s2615_s2 + $0x50] sm:$0xff]  ;;  %v284_v26 = vld [vmem:[%s2614_s1 + $0x60] sm:$0xff]  ;;  %v403_v27 = vld [vmem:[%s2615_s2 + $0x68] sm:$0xff]  ;;  %s2622_s25 = smov (!%p264_p3, %s1469_s25), 1 }
   0xe   : > { %v402_v28 = vld [vmem:[%s2615_s2 + $0x60] sm:$0xff]  ;;  %v287_v29 = vld [vmem:[%s2614_s1 + $0x78] sm:$0xff]  ;;  %v286_v30 = vld [vmem:[%s2614_s1 + $0x70] sm:$0xff]  ;;  %s266_s9 = scalar_lea.vmem %s2613_s0, %s2622_s25  ;;  %s1474_s14 = sshll.u32 %s2622_s25, 3 }
   0xf   : > { %305 = vperm.xlu1 %1991, %v275_v5   ;;  %300 = vperm.xlu0 %1990, %v274_v6   ;;  %v405_v31 = vld [vmem:[%s2615_s2 + $0x78] sm:$0xff]  ;;  %v404_v32 = vld [vmem:[%s2615_s2 + $0x70] sm:$0xff]  ;;  %v535_v33 = vld [vmem:[%s2617_s4 + $0x8] sm:$0xff]  ;;  %s270_s17 = scalar_lea.vmem %s2620_s7, %s1474_s14 }
  0x10   : > { %v534_v34 = vld [vmem:[%s2617_s4] sm:$0xff]  ;;  %v537_v35 = vld [vmem:[%s2617_s4 + $0x18] sm:$0xff]  ;;  %v536_v36 = vld [vmem:[%s2617_s4 + $0x10] sm:$0xff] }
  0x11   : > { %v539_v37 = vld [vmem:[%s2617_s4 + $0x28] sm:$0xff]  ;;  %v538_v38 = vld [vmem:[%s2617_s4 + $0x20] sm:$0xff]  ;;  %v541_v39 = vld [vmem:[%s2617_s4 + $0x38] sm:$0xff] }
  0x12   : > { %v540_v40 = vld [vmem:[%s2617_s4 + $0x30] sm:$0xff]  ;;  %v543_v41 = vld [vmem:[%s2617_s4 + $0x48] sm:$0xff]  ;;  %v542_v42 = vld [vmem:[%s2617_s4 + $0x40] sm:$0xff] }
  0x13   : > { %423 = vperm.xlu1 %1991, %v393_v7   ;;  %418 = vperm.xlu0 %1990, %v392_v8   ;;  %v518_v43 = vld [vmem:[%s2616_s3] sm:$0xff]  ;;  %v545_v44 = vld [vmem:[%s2617_s4 + $0x58] sm:$0xff]  ;;  %v544_v45 = vld [vmem:[%s2617_s4 + $0x50] sm:$0xff] }
  0x14   : > { %1687 = vmatprep.mubr.f32.mxu0 %v518_v43  ;;  %v547_v46 = vld [vmem:[%s2617_s4 + $0x68] sm:$0xff]  ;;  %v546_v47 = vld [vmem:[%s2617_s4 + $0x60] sm:$0xff]  ;;  %v549_v48 = vld [vmem:[%s2617_s4 + $0x78] sm:$0xff] }
  0x15   : > { %v548_v49 = vld [vmem:[%s2617_s4 + $0x70] sm:$0xff]  ;;  %v1493_v50 = vld [vmem:[%s2617_s4 + $0x88] sm:$0xff]  ;;  %v1492_v51 = vld [vmem:[%s2617_s4 + $0x80] sm:$0xff] }
  0x16   : > { %v1495_v52 = vld [vmem:[%s2617_s4 + $0x98] sm:$0xff]  ;;  %v1494_v53 = vld [vmem:[%s2617_s4 + $0x90] sm:$0xff]  ;;  %v1497_v54 = vld [vmem:[%s2617_s4 + $0xa8] sm:$0xff] }
  0x17   : > { %315 = vperm.xlu1 %1991, %v277_v9   ;;  %310 = vperm.xlu0 %1990, %v276_v10   ;;  %v1496_v55 = vld [vmem:[%s2617_s4 + $0xa0] sm:$0xff]  ;;  %v1499_v56 = vld [vmem:[%s2617_s4 + $0xb8] sm:$0xff]  ;;  %v1498_v57 = vld [vmem:[%s2617_s4 + $0xb0] sm:$0xff] }
  0x18   : > { %v1501_v58 = vld [vmem:[%s2617_s4 + $0xc8] sm:$0xff]  ;;  %v1500_v59 = vld [vmem:[%s2617_s4 + $0xc0] sm:$0xff]  ;;  %v1503_v60 = vld [vmem:[%s2617_s4 + $0xd8] sm:$0xff] }
  0x19   : > { %v1502_v61 = vld [vmem:[%s2617_s4 + $0xd0] sm:$0xff]  ;;  %v1505_v62 = vld [vmem:[%s2617_s4 + $0xe8] sm:$0xff]  ;;  %v1504_v63 = vld [vmem:[%s2617_s4 + $0xe0] sm:$0xff] }
  0x1a   : > { %v1507_v0 = vld [vmem:[%s2617_s4 + $0xf8] sm:$0xff]  ;;  %v1506_v1 = vld [vmem:[%s2617_s4 + $0xf0] sm:$0xff]  ;;  %v2385_v2 = vld [vmem:[%s266_s9] ss:$0 sm:$0xff] }
  0x1b   : > { %433 = vperm.xlu1 %1991, %v395_v11   ;;  %428 = vperm.xlu0 %1990, %v394_v12   ;;  %v1525_v3 = vld [vmem:[%s2617_s4 + $0x108] sm:$0xff]  ;;  %v1524_v4 = vld [vmem:[%s2617_s4 + $0x100] sm:$0xff]  ;;  %v1527_v8 = vld [vmem:[%s2617_s4 + $0x118] sm:$0xff] }
  0x1c   : > { %v1526_v9 = vld [vmem:[%s2617_s4 + $0x110] sm:$0xff]  ;;  %v1536_v43 = vld [vmem:[%s2617_s4 + $0x160] sm:$0xff] }
  0x1f   : > { %325 = vperm.xlu1 %1991, %v279_v13   ;;  %320 = vperm.xlu0 %1990, %v278_v14   ;;  %v1529_v14 = vld [vmem:[%s2617_s4 + $0x128] sm:$0xff] }
  0x23   : > { %443 = vperm.xlu1 %1991, %v397_v15   ;;  %438 = vperm.xlu0 %1990, %v396_v16   ;;  %v1528_v15 = vld [vmem:[%s2617_s4 + $0x120] sm:$0xff] }
  0x27   : > { %335 = vperm.xlu1 %1991, %v281_v17   ;;  %330 = vperm.xlu0 %1990, %v280_v18  }
  0x2b   : > { %453 = vperm.xlu1 %1991, %v399_v19   ;;  %448 = vperm.xlu0 %1990, %v398_v20   ;;  %v1531_v19 = vld [vmem:[%s2617_s4 + $0x138] sm:$0xff]  ;;  %v1530_v20 = vld [vmem:[%s2617_s4 + $0x130] sm:$0xff] }
  0x2f   : > { %345 = vperm.xlu1 %1991, %v283_v21   ;;  %340 = vperm.xlu0 %1990, %v282_v22  }
  0x33   : > { %463 = vperm.xlu1 %1991, %v401_v23   ;;  %458 = vperm.xlu0 %1990, %v400_v24  }
  0x37   : > { %355 = vperm.xlu1 %1991, %v285_v25   ;;  %350 = vperm.xlu0 %1990, %v284_v26  }
  0x3b   : > { %473 = vperm.xlu1 %1991, %v403_v27   ;;  %468 = vperm.xlu0 %1990, %v402_v28   ;;  %v1533_v27 = vld [vmem:[%s2617_s4 + $0x148] sm:$0xff]  ;;  %v1532_v28 = vld [vmem:[%s2617_s4 + $0x140] sm:$0xff] }
  0x3f   : > { %365 = vperm.xlu1 %1991, %v287_v29   ;;  %360 = vperm.xlu0 %1990, %v286_v30  }
  0x43   : > { %483 = vperm.xlu1 %1991, %v405_v31   ;;  %478 = vperm.xlu0 %1990, %v404_v32   ;;  %v1535_v32 = vld [vmem:[%s2617_s4 + $0x158] sm:$0xff] }
  0x47   : > { %557 = vperm.xlu1 %1991, %v535_v33   ;;  %552 = vperm.xlu0 %1990, %v534_v34   ;;  %v1534_v33 = vld [vmem:[%s2617_s4 + $0x150] sm:$0xff] }
  0x4b   : > { %567 = vperm.xlu1 %1991, %v537_v35   ;;  %562 = vperm.xlu0 %1990, %v536_v36  }
  0x4f   : > { %577 = vperm.xlu1 %1991, %v539_v37   ;;  %572 = vperm.xlu0 %1990, %v538_v38  }
  0x53   : > { %587 = vperm.xlu1 %1991, %v541_v39   ;;  %582 = vperm.xlu0 %1990, %v540_v40  }
  0x57   : > { %597 = vperm.xlu1 %1991, %v543_v41   ;;  %592 = vperm.xlu0 %1990, %v542_v42   ;;  %v1537_v42 = vld [vmem:[%s2617_s4 + $0x168] sm:$0xff] }
  0x5b   : > { %607 = vperm.xlu1 %1991, %v545_v44   ;;  %602 = vperm.xlu0 %1990, %v544_v45  }
  0x5f   : > { %617 = vperm.xlu1 %1991, %v547_v46   ;;  %612 = vperm.xlu0 %1990, %v546_v47  }
  0x63   : > { %627 = vperm.xlu1 %1991, %v549_v48   ;;  %622 = vperm.xlu0 %1990, %v548_v49   ;;  %v1539_v48 = vld [vmem:[%s2617_s4 + $0x178] sm:$0xff] }
  0x67   : > { %832 = vperm.xlu1 %1991, %v1493_v50   ;;  %827 = vperm.xlu0 %1990, %v1492_v51  }
  0x6b   : > { %842 = vperm.xlu1 %1991, %v1495_v52   ;;  %837 = vperm.xlu0 %1990, %v1494_v53   ;;  %v1538_v52 = vld [vmem:[%s2617_s4 + $0x170] sm:$0xff] }
  0x6f   : > { %852 = vperm.xlu1 %1991, %v1497_v54   ;;  %847 = vperm.xlu0 %1990, %v1496_v55  }
  0x73   : > { %862 = vperm.xlu1 %1991, %v1499_v56   ;;  %857 = vperm.xlu0 %1990, %v1498_v57   ;;  %v1342_v57 = vld [vmem:[%s2619_s6] sm:$0xff] }
  0x77   : > { %872 = vperm.xlu1 %1991, %v1501_v58   ;;  %867 = vperm.xlu0 %1990, %v1500_v59  }
  0x7b   : > { %882 = vperm.xlu1 %1991, %v1503_v60   ;;  %877 = vperm.xlu0 %1990, %v1502_v61  }
  0x7f   : > { %892 = vperm.xlu1 %1991, %v1505_v62   ;;  %887 = vperm.xlu0 %1990, %v1504_v63  }
  0x83   : > { %902 = vperm.xlu1 %1991, %v1507_v0   ;;  %897 = vperm.xlu0 %1990, %v1506_v1  }
  0x86   : > { %v409_v5 = vpop.permute.xlu1 %408  ;;  %v291_v6 = vpop.permute.xlu0 %290 }
  0x87   : > { %v374_v7 = vmul.f32 %v2385_v2, %v291_v6  ;;  %1107 = vperm.xlu1 %1991, %v1525_v3   ;;  %1102 = vperm.xlu0 %1990, %v1524_v4  }
  0x89   : > { %v486_v10 = vadd.f32 %v409_v5, %v374_v7 }
  0x8a   : > { %v414_v11 = vpop.permute.xlu1 %413  ;;  %v296_v12 = vpop.permute.xlu0 %295 }
  0x8b   : > { %v375_v13 = vmul.f32 %v2385_v2, %v296_v12  ;;  %1117 = vperm.xlu1 %1991, %v1527_v8   ;;  %1112 = vperm.xlu0 %1990, %v1526_v9   ;;  %1992 = vtanh.f32 %v486_v10 }
  0x8d   : > { %v487_v16 = vadd.f32 %v414_v11, %v375_v13 }
  0x8e   : > { %v306_v17 = vpop.permute.xlu1 %305  ;;  %v301_v18 = vpop.permute.xlu0 %300 }
  0x8f   : > { %1994 = vtanh.f32 %v487_v16  ;;  %1127 = vperm.xlu1 %1991, %v1529_v14   ;;  %1122 = vperm.xlu0 %1990, %v1528_v15   ;;  %v377_v21 = vmul.f32 %v2385_v2, %v306_v17  ;;  %v376_v22 = vmul.f32 %v2385_v2, %v301_v18 }
  0x92   : > { %v424_v23 = vpop.permute.xlu1 %423  ;;  %v419_v24 = vpop.permute.xlu0 %418 }
  0x93   : > { %v489_v25 = vadd.f32 %v424_v23, %v377_v21  ;;  %v488_v26 = vadd.f32 %v419_v24, %v376_v22  ;;  %1137 = vperm.xlu1 %1991, %v1531_v19   ;;  %1132 = vperm.xlu0 %1990, %v1530_v20  }
  0x95   : > { %1996 = vtanh.f32 %v489_v25  ;;  %v1993_v31 = vpop.eup %1992 }
  0x96   : > { %1998 = vtanh.f32 %v488_v26  ;;  %v316_v29 = vpop.permute.xlu1 %315  ;;  %v311_v30 = vpop.permute.xlu0 %310 }
  0x97   : > { %1147 = vperm.xlu1 %1991, %v1533_v27   ;;  %1142 = vperm.xlu0 %1990, %v1532_v28   ;;  %v379_v35 = vmul.f32 %v2385_v2, %v316_v29  ;;  %v378_v36 = vmul.f32 %v2385_v2, %v311_v30 }
  0x99   : > { %v1995_v34 = vpop.eup %1994 }
  0x9a   : > { %v434_v37 = vpop.permute.xlu1 %433  ;;  %v429_v38 = vpop.permute.xlu0 %428  ;;  %v1858_v39 = vpack.c.bf16 %v1995_v34, %v1993_v31 }
  0x9b   : > { %v491_v40 = vadd.f32 %v434_v37, %v379_v35  ;;  %v490_v41 = vadd.f32 %v429_v38, %v378_v36  ;;  %1157 = vperm.xlu1 %1991, %v1535_v32   ;;  %1152 = vperm.xlu0 %1990, %v1534_v33  }
  0x9c   : > { %1859 = vmatprep.subr.bf16.mxu0 %v1858_v39 }
  0x9d   : > { %2000 = vtanh.f32 %v491_v40  ;;  %1861 = vmatpush3.bf16.msra.mxu0 %v1858_v39 }
  0x9e   : > { %2002 = vtanh.f32 %v490_v41  ;;  %v326_v44 = vpop.permute.xlu1 %325  ;;  %v321_v45 = vpop.permute.xlu0 %320 }
  0x9f   : > { %v1997_v46 = vpop.eup %1996  ;;  %1167 = vperm.xlu1 %1991, %v1537_v42   ;;  %1162 = vperm.xlu0 %1990, %v1536_v43   ;;  %v381_v49 = vmul.f32 %v2385_v2, %v326_v44  ;;  %v380_v50 = vmul.f32 %v2385_v2, %v321_v45  ;;  %v520_v45 = vld [vmem:[%s2616_s3 + $0x10] sm:$0xff] }
  0xa0   : > { %v1999_v47 = vpop.eup %1998 }
  0xa1   : > { %v1862_v51 = vpack.c.bf16 %v1997_v46, %v1999_v47  ;;  %v521_v46 = vld [vmem:[%s2616_s3 + $0x18] sm:$0xff]  ;;  %v522_v47 = vld [vmem:[%s2616_s3 + $0x20] sm:$0xff] }
  0xa2   : > { %v444_v53 = vpop.permute.xlu1 %443  ;;  %v439_v54 = vpop.permute.xlu0 %438 }
  0xa3   : > { %v493_v55 = vadd.f32 %v444_v53, %v381_v49  ;;  %v492_v56 = vadd.f32 %v439_v54, %v380_v50  ;;  %1863 = vmatprep.subr.bf16.mxu0 %v1862_v51  ;;  %1177 = vperm.xlu1 %1991, %v1539_v48   ;;  %v523_v48 = vld [vmem:[%s2616_s3 + $0x28] sm:$0xff]  ;;  %v524_v49 = vld [vmem:[%s2616_s3 + $0x30] sm:$0xff]  ;;  %v525_v50 = vld [vmem:[%s2616_s3 + $0x38] sm:$0xff] }
  0xa4   : > { %1172 = vperm.xlu0 %1990, %v1538_v52   ;;  %1865 = vmatpush3.bf16.msra.mxu0 %v1862_v51  ;;  %v526_v51 = vld [vmem:[%s2616_s3 + $0x40] sm:$0xff]  ;;  %v527_v52 = vld [vmem:[%s2616_s3 + $0x48] sm:$0xff]  ;;  %v528_v53 = vld [vmem:[%s2616_s3 + $0x50] sm:$0xff] }
  0xa5   : > { %2004 = vtanh.f32 %v493_v55  ;;  %v529_v54 = vld [vmem:[%s2616_s3 + $0x58] sm:$0xff]  ;;  %v530_v55 = vld [vmem:[%s2616_s3 + $0x60] sm:$0xff] }
  0xa6   : > { %2006 = vtanh.f32 %v492_v56  ;;  %v336_v58 = vpop.permute.xlu1 %335  ;;  %v331_v59 = vpop.permute.xlu0 %330  ;;  %v531_v56 = vld [vmem:[%s2616_s3 + $0x68] sm:$0xff] }
  0xa7   : > { %v2001_v60 = vpop.eup %2000  ;;  %v383_v62 = vmul.f32 %v2385_v2, %v336_v58  ;;  %v382_v63 = vmul.f32 %v2385_v2, %v331_v59  ;;  %v533_v58 = vld [vmem:[%s2616_s3 + $0x78] sm:$0xff]  ;;  %v1476_v59 = vld [vmem:[%s2616_s3 + $0x80] sm:$0xff] }
  0xa8   : > { %v2003_v61 = vpop.eup %2002  ;;  %1345 = vperm.xlu0 %1990, %v1342_v57   ;;  %v532_v57 = vld [vmem:[%s2616_s3 + $0x70] sm:$0xff]  ;;  %1743 = vmatprep.mubr.f32.mxu1 %v1476_v59 }
  0xa9   : > { %v1866_v0 = vpack.c.bf16 %v2001_v60, %v2003_v61 }
  0xaa   : > { %v454_v1 = vpop.permute.xlu1 %453  ;;  %v449_v3 = vpop.permute.xlu0 %448 }
  0xab   : > { %v495_v4 = vadd.f32 %v454_v1, %v383_v62  ;;  %v494_v5 = vadd.f32 %v449_v3, %v382_v63  ;;  %1867 = vmatprep.subr.bf16.mxu0 %v1866_v0 }
  0xac   : > { %1869 = vmatpush3.bf16.msra.mxu0 %v1866_v0 }
  0xad   : > { %2008 = vtanh.f32 %v495_v4 }
  0xae   : > { %2010 = vtanh.f32 %v494_v5  ;;  %v346_v6 = vpop.permute.xlu1 %345  ;;  %v341_v7 = vpop.permute.xlu0 %340 }
  0xaf   : > { %v2005_v8 = vpop.eup %2004  ;;  %v385_v10 = vmul.f32 %v2385_v2, %v346_v6  ;;  %v384_v11 = vmul.f32 %v2385_v2, %v341_v7 }
  0xb0   : > { %v2007_v9 = vpop.eup %2006 }
  0xb1   : > { %v1870_v12 = vpack.c.bf16 %v2005_v8, %v2007_v9 }
  0xb2   : > { %v464_v13 = vpop.permute.xlu1 %463  ;;  %v459_v14 = vpop.permute.xlu0 %458 }
  0xb3   : > { %v497_v15 = vadd.f32 %v464_v13, %v385_v10  ;;  %v496_v16 = vadd.f32 %v459_v14, %v384_v11  ;;  %1871 = vmatprep.subr.bf16.mxu0 %v1870_v12 }
  0xb4   : > { %1873 = vmatpush3.bf16.msra.mxu0 %v1870_v12 }
  0xb5   : > { %2012 = vtanh.f32 %v497_v15 }
  0xb6   : > { %2014 = vtanh.f32 %v496_v16  ;;  %v356_v17 = vpop.permute.xlu1 %355  ;;  %v351_v18 = vpop.permute.xlu0 %350 }
  0xb7   : > { %v2009_v19 = vpop.eup %2008  ;;  %v387_v21 = vmul.f32 %v2385_v2, %v356_v17  ;;  %v386_v22 = vmul.f32 %v2385_v2, %v351_v18 }
  0xb8   : > { %v2011_v20 = vpop.eup %2010 }
  0xb9   : > { %v1874_v23 = vpack.c.bf16 %v2009_v19, %v2011_v20 }
  0xba   : > { %v474_v24 = vpop.permute.xlu1 %473  ;;  %v469_v25 = vpop.permute.xlu0 %468 }
  0xbb   : > { %v499_v26 = vadd.f32 %v474_v24, %v387_v21  ;;  %v498_v27 = vadd.f32 %v469_v25, %v386_v22  ;;  %1875 = vmatprep.subr.bf16.mxu0 %v1874_v23 }
  0xbc   : > { %1877 = vmatpush3.bf16.msra.mxu0 %v1874_v23 }
  0xbd   : > { %2016 = vtanh.f32 %v499_v26 }
  0xbe   : > { %2018 = vtanh.f32 %v498_v27  ;;  %v366_v28 = vpop.permute.xlu1 %365  ;;  %v361_v29 = vpop.permute.xlu0 %360 }
  0xbf   : > { %v2013_v30 = vpop.eup %2012  ;;  %v389_v32 = vmul.f32 %v2385_v2, %v366_v28  ;;  %v388_v33 = vmul.f32 %v2385_v2, %v361_v29  ;;  %v519_v2 = vld [vmem:[%s2616_s3 + $0x8] sm:$0xff] }
  0xc0   : > { %v2015_v31 = vpop.eup %2014 }
  0xc1   : > { %v1878_v34 = vpack.c.bf16 %v2013_v30, %v2015_v31 }
  0xc2   : > { %v484_v35 = vpop.permute.xlu1 %483  ;;  %v479_v36 = vpop.permute.xlu0 %478 }
  0xc3   : > { %v501_v37 = vadd.f32 %v484_v35, %v389_v32  ;;  %v500_v38 = vadd.f32 %v479_v36, %v388_v33  ;;  %1879 = vmatprep.subr.bf16.mxu0 %v1878_v34 }
  0xc4   : > { %1881 = vmatpush3.bf16.msra.mxu0 %v1878_v34 }
  0xc5   : > { %2020 = vtanh.f32 %v501_v37 }
  0xc6   : > { %2022 = vtanh.f32 %v500_v38  ;;  %v558_v60 = vpop.permute.xlu1 %557  ;;  %v553_v61 = vpop.permute.xlu0 %552 }
  0xc7   : > { %v2017_v39 = vpop.eup %2016 }
  0xc8   : > { %v2019_v40 = vpop.eup %2018 }
  0xc9   : > { %v1882_v41 = vpack.c.bf16 %v2017_v39, %v2019_v40 }
  0xca   : > { %v568_v62 = vpop.permute.xlu1 %567  ;;  %v563_v63 = vpop.permute.xlu0 %562 }
  0xcb   : > { %1883 = vmatprep.subr.bf16.mxu0 %v1882_v41 }
  0xcc   : > { %1885 = vmatpush3.bf16.msra.mxu0 %v1882_v41 }
  0xce   : > { %v578_v0 = vpop.permute.xlu1 %577  ;;  %v573_v1 = vpop.permute.xlu0 %572 }
  0xcf   : > { %v2021_v42 = vpop.eup %2020 }
  0xd0   : > { %v2023_v43 = vpop.eup %2022 }
  0xd1   : > { %v1886_v44 = vpack.c.bf16 %v2021_v42, %v2023_v43 }
  0xd2   : > { %v588_v7 = vpop.permute.xlu1 %587  ;;  %v583_v9 = vpop.permute.xlu0 %582 }
  0xd3   : > { %1887 = vmatprep.subr.bf16.mxu0 %v1886_v44 }
  0xd4   : > { %1889 = vmatpush3.bf16.msra.mxu0 %v1886_v44 }
  0xd6   : > { %v598_v16 = vpop.permute.xlu1 %597  ;;  %v593_v18 = vpop.permute.xlu0 %592 }
  0xd7   : > { %1688 = vmatmul.mubr.f32.vlgmr.msra.gmra.mrb[0].mxu0 %v519_v2 }
  0xd8   : > { %1690 = vmatprep.mubr.f32.mxu0 %v520_v45 }
  0xda   : > { %v608_v26 = vpop.permute.xlu1 %607  ;;  %v603_v29 = vpop.permute.xlu0 %602 }
  0xdb   : > { %1691 = vmatmul.mubr.f32.gmra.mrb[2].mxu0 %v521_v46 }
  0xdc   : > { %1693 = vmatprep.mubr.f32.mxu0 %v522_v47 }
  0xde   : > { %v618_v40 = vpop.permute.xlu1 %617  ;;  %v613_v42 = vpop.permute.xlu0 %612 }
  0xdf   : > { %1694 = vmatmul.mubr.f32.gmra.mrb[4].mxu0 %v523_v48 }
  0xe0   : > { %1696 = vmatprep.mubr.f32.mxu0 %v524_v49 }
  0xe3   : > { %1697 = vmatmul.mubr.f32.gmra.mrb[6].mxu0 %v525_v50  ;;  %v628_v50 = vpop.permute.xlu1 %627 }
  0xe4   : > { %1699 = vmatprep.mubr.f32.mxu0 %v526_v51 }
  0xe7   : > { %1700 = vmatmul.mubr.f32.gmra.mrb[8].mxu0 %v527_v52 }
  0xe8   : > { %1702 = vmatprep.mubr.f32.mxu0 %v528_v53  ;;  %v623_v53 = vpop.permute.xlu0 %622 }
  0xeb   : > { %1703 = vmatmul.mubr.f32.gmra.mrb[10].mxu0 %v529_v54 }
  0xec   : > { %1705 = vmatprep.mubr.f32.mxu0 %v530_v55 }
  0xef   : > { %1706 = vmatmul.mubr.f32.gmra.mrb[12].mxu0 %v531_v56 }
  0xf0   : > { %1708 = vmatprep.mubr.f32.mxu0 %v532_v57 }
  0xf3   : > { %1709 = vmatmul.mubr.f32.gmra.mrb[14].mxu0 %v533_v58 }
 0x1aa   : > { %v1689_v3 = vpop.f32.mrb[0].mxu0 }
 0x1ab   : > { %v702_v4 = vadd.f32 %v1689_v3, %v558_v60  ;;  %v696_v5 = vpop.f32.mrb[1].mxu0 }
 0x1ac   : > { %v697_v6 = vadd.f32 %v696_v5, %v553_v61  ;;  %v1477_v5 = vld [vmem:[%s2616_s3 + $0x88] sm:$0xff] }
 0x1ad   : > { %2024 = vtanh.f32 %v702_v4 }
 0x1ae   : > { %2026 = vtanh.f32 %v697_v6  ;;  %v1692_v8 = vpop.f32.mrb[2].mxu0  ;;  %v1478_v6 = vld [vmem:[%s2616_s3 + $0x90] sm:$0xff] }
 0x1af   : > { %v712_v10 = vadd.f32 %v1692_v8, %v568_v62  ;;  %v706_v11 = vpop.f32.mrb[3].mxu0  ;;  %v1480_v8 = vld [vmem:[%s2616_s3 + $0xa0] sm:$0xff] }
 0x1b0   : > { %v707_v12 = vadd.f32 %v706_v11, %v563_v63  ;;  %v1483_v11 = vld [vmem:[%s2616_s3 + $0xb8] sm:$0xff] }
 0x1b1   : > { %2028 = vtanh.f32 %v712_v10  ;;  %v1482_v10 = vld [vmem:[%s2616_s3 + $0xb0] sm:$0xff] }
 0x1b2   : > { %2030 = vtanh.f32 %v707_v12  ;;  %v1695_v13 = vpop.f32.mrb[4].mxu0  ;;  %v1484_v12 = vld [vmem:[%s2616_s3 + $0xc0] sm:$0xff] }
 0x1b3   : > { %v722_v14 = vadd.f32 %v1695_v13, %v578_v0  ;;  %v716_v15 = vpop.f32.mrb[5].mxu0  ;;  %v1485_v13 = vld [vmem:[%s2616_s3 + $0xc8] sm:$0xff] }
 0x1b4   : > { %v717_v17 = vadd.f32 %v716_v15, %v573_v1  ;;  %v1487_v15 = vld [vmem:[%s2616_s3 + $0xd8] sm:$0xff] }
 0x1b5   : > { %2032 = vtanh.f32 %v722_v14  ;;  %v1486_v14 = vld [vmem:[%s2616_s3 + $0xd0] sm:$0xff] }
 0x1b6   : > { %2034 = vtanh.f32 %v717_v17  ;;  %v1698_v19 = vpop.f32.mrb[6].mxu0  ;;  %v1489_v17 = vld [vmem:[%s2616_s3 + $0xe8] sm:$0xff] }
 0x1b7   : > { %v2025_v20 = vpop.eup %2024  ;;  %v732_v21 = vadd.f32 %v1698_v19, %v588_v7  ;;  %v726_v22 = vpop.f32.mrb[7].mxu0  ;;  %v1479_v7 = vld [vmem:[%s2616_s3 + $0x98] sm:$0xff] }
 0x1b8   : > { %v2027_v23 = vpop.eup %2026  ;;  %v727_v24 = vadd.f32 %v726_v22, %v583_v9  ;;  %v1481_v9 = vld [vmem:[%s2616_s3 + $0xa8] sm:$0xff]  ;;  %v1491_v19 = vld [vmem:[%s2616_s3 + $0xf8] sm:$0xff]  ;;  %v828_v22 = vpop.permute.xlu0 %827 }
 0x1b9   : > { %2036 = vtanh.f32 %v732_v21  ;;  %v1890_v25 = vpack.c.bf16 %v2025_v20, %v2027_v23  ;;  %v1508_v20 = vld [vmem:[%s2616_s3 + $0x100] sm:$0xff]  ;;  %v833_v21 = vpop.permute.xlu1 %832 }
 0x1ba   : > { %2038 = vtanh.f32 %v727_v24  ;;  %v1701_v27 = vpop.f32.mrb[8].mxu0  ;;  %1799 = vmatprep.mubr.f32.mxu0 %v1508_v20 }
 0x1bb   : > { %v2029_v28 = vpop.eup %2028  ;;  %v742_v30 = vadd.f32 %v1701_v27, %v598_v16  ;;  %v736_v31 = vpop.f32.mrb[9].mxu0  ;;  %1891 = vmatprep.subr.bf16.mxu1 %v1890_v25  ;;  %v1488_v16 = vld [vmem:[%s2616_s3 + $0xe0] sm:$0xff] }
 0x1bc   : > { %v2031_v32 = vpop.eup %2030  ;;  %v737_v33 = vadd.f32 %v736_v31, %v593_v18  ;;  %1893 = vmatpush3.bf16.msra.mxu1 %v1890_v25  ;;  %v1490_v18 = vld [vmem:[%s2616_s3 + $0xf0] sm:$0xff]  ;;  %v838_v24 = vpop.permute.xlu0 %837 }
 0x1bd   : > { %2040 = vtanh.f32 %v742_v30  ;;  %v1894_v34 = vpack.c.bf16 %v2029_v28, %v2031_v32  ;;  %v843_v23 = vpop.permute.xlu1 %842 }
 0x1be   : > { %2042 = vtanh.f32 %v737_v33  ;;  %v1704_v35 = vpop.f32.mrb[10].mxu0 }
 0x1bf   : > { %v2033_v36 = vpop.eup %2032  ;;  %v752_v37 = vadd.f32 %v1704_v35, %v608_v26  ;;  %v746_v38 = vpop.f32.mrb[11].mxu0  ;;  %1895 = vmatprep.subr.bf16.mxu1 %v1894_v34 }
 0x1c0   : > { %v2035_v39 = vpop.eup %2034  ;;  %v747_v41 = vadd.f32 %v746_v38, %v603_v29  ;;  %1897 = vmatpush3.bf16.msra.mxu1 %v1894_v34  ;;  %v848_v26 = vpop.permute.xlu0 %847 }
 0x1c1   : > { %2044 = vtanh.f32 %v752_v37  ;;  %v1898_v43 = vpack.c.bf16 %v2033_v36, %v2035_v39  ;;  %v853_v25 = vpop.permute.xlu1 %852 }
 0x1c2   : > { %2046 = vtanh.f32 %v747_v41  ;;  %v1707_v44 = vpop.f32.mrb[12].mxu0 }
 0x1c3   : > { %v2037_v2 = vpop.eup %2036  ;;  %v762_v45 = vadd.f32 %v1707_v44, %v618_v40  ;;  %v756_v46 = vpop.f32.mrb[13].mxu0  ;;  %1899 = vmatprep.subr.bf16.mxu1 %v1898_v43 }
 0x1c4   : > { %v2039_v47 = vpop.eup %2038  ;;  %v757_v48 = vadd.f32 %v756_v46, %v613_v42  ;;  %1901 = vmatpush3.bf16.msra.mxu1 %v1898_v43  ;;  %v858_v33 = vpop.permute.xlu0 %857 }
 0x1c5   : > { %2048 = vtanh.f32 %v762_v45  ;;  %v1902_v49 = vpack.c.bf16 %v2037_v2, %v2039_v47  ;;  %v863_v31 = vpop.permute.xlu1 %862 }
 0x1c6   : > { %2050 = vtanh.f32 %v757_v48  ;;  %v1710_v51 = vpop.f32.mrb[14].mxu0 }
 0x1c7   : > { %v2041_v52 = vpop.eup %2040  ;;  %v772_v54 = vadd.f32 %v1710_v51, %v628_v50  ;;  %v766_v55 = vpop.f32.mrb[15].mxu0  ;;  %1903 = vmatprep.subr.bf16.mxu1 %v1902_v49 }
 0x1c8   : > { %v2043_v56 = vpop.eup %2042  ;;  %v767_v57 = vadd.f32 %v766_v55, %v623_v53  ;;  %1905 = vmatpush3.bf16.msra.mxu1 %v1902_v49  ;;  %v868_v42 = vpop.permute.xlu0 %867 }
 0x1c9   : > { %2052 = vtanh.f32 %v772_v54  ;;  %v1906_v58 = vpack.c.bf16 %v2041_v52, %v2043_v56  ;;  %v873_v40 = vpop.permute.xlu1 %872 }
 0x1ca   : > { %2054 = vtanh.f32 %v767_v57 }
 0x1cb   : > { %v2045_v59 = vpop.eup %2044  ;;  %1907 = vmatprep.subr.bf16.mxu1 %v1906_v58 }
 0x1cc   : > { %v2047_v60 = vpop.eup %2046  ;;  %1909 = vmatpush3.bf16.msra.mxu1 %v1906_v58  ;;  %v878_v52 = vpop.permute.xlu0 %877 }
 0x1cd   : > { %v1910_v61 = vpack.c.bf16 %v2045_v59, %v2047_v60  ;;  %v883_v49 = vpop.permute.xlu1 %882 }
 0x1cf   : > { %v2049_v62 = vpop.eup %2048  ;;  %1911 = vmatprep.subr.bf16.mxu1 %v1910_v61 }
 0x1d0   : > { %v2051_v63 = vpop.eup %2050  ;;  %1913 = vmatpush3.bf16.msra.mxu1 %v1910_v61 }
 0x1d1   : > { %v1914_v0 = vpack.c.bf16 %v2049_v62, %v2051_v63  ;;  %v893_v63 = vpop.permute.xlu1 %892 }
 0x1d3   : > { %v2053_v1 = vpop.eup %2052  ;;  %1915 = vmatprep.subr.bf16.mxu1 %v1914_v0 }
 0x1d4   : > { %v2055_v3 = vpop.eup %2054  ;;  %1917 = vmatpush3.bf16.msra.mxu1 %v1914_v0 }
 0x1d5   : > { %v1918_v4 = vpack.c.bf16 %v2053_v1, %v2055_v3  ;;  %v888_v1 = vpop.permute.xlu0 %887 }
 0x1d7   : > { %1919 = vmatprep.subr.bf16.mxu1 %v1918_v4 }
 0x1d8   : > { %1921 = vmatpush3.bf16.msra.mxu1 %v1918_v4 }
 0x1db   : > { %1744 = vmatmul.mubr.f32.vlgmr.msra.gmra.mrb[0].mxu1 %v1477_v5 }
 0x1dc   : > { %1746 = vmatprep.mubr.f32.mxu1 %v1478_v6 }
 0x1df   : > { %1747 = vmatmul.mubr.f32.gmra.mrb[2].mxu1 %v1479_v7 }
 0x1e0   : > { %1749 = vmatprep.mubr.f32.mxu1 %v1480_v8 }
 0x1e3   : > { %1750 = vmatmul.mubr.f32.gmra.mrb[4].mxu1 %v1481_v9 }
 0x1e4   : > { %1752 = vmatprep.mubr.f32.mxu1 %v1482_v10 }
 0x1e7   : > { %1753 = vmatmul.mubr.f32.gmra.mrb[6].mxu1 %v1483_v11  ;;  %v903_v11 = vpop.permute.xlu1 %902 }
 0x1e8   : > { %1755 = vmatprep.mubr.f32.mxu1 %v1484_v12 }
 0x1eb   : > { %1756 = vmatmul.mubr.f32.gmra.mrb[8].mxu1 %v1485_v13 }
 0x1ec   : > { %1758 = vmatprep.mubr.f32.mxu1 %v1486_v14  ;;  %v898_v14 = vpop.permute.xlu0 %897 }
 0x1ef   : > { %1759 = vmatmul.mubr.f32.gmra.mrb[10].mxu1 %v1487_v15 }
 0x1f0   : > { %1761 = vmatprep.mubr.f32.mxu1 %v1488_v16 }
 0x1f3   : > { %1762 = vmatmul.mubr.f32.gmra.mrb[12].mxu1 %v1489_v17 }
 0x1f4   : > { %1764 = vmatprep.mubr.f32.mxu1 %v1490_v18 }
 0x1f7   : > { %1765 = vmatmul.mubr.f32.gmra.mrb[14].mxu1 %v1491_v19 }
 0x2ae   : > { %v1745_v27 = vpop.f32.mrb[0].mxu1 }
 0x2af   : > { %v977_v28 = vadd.f32 %v1745_v27, %v833_v21  ;;  %v971_v29 = vpop.f32.mrb[1].mxu1 }
 0x2b0   : > { %v972_v30 = vadd.f32 %v971_v29, %v828_v22  ;;  %v1509_v29 = vld [vmem:[%s2616_s3 + $0x108] sm:$0xff] }
 0x2b1   : > { %2056 = vtanh.f32 %v977_v28 }
 0x2b2   : > { %2058 = vtanh.f32 %v972_v30  ;;  %v1748_v32 = vpop.f32.mrb[2].mxu1  ;;  %v1510_v30 = vld [vmem:[%s2616_s3 + $0x110] sm:$0xff] }
 0x2b3   : > { %v987_v34 = vadd.f32 %v1748_v32, %v843_v23  ;;  %v981_v35 = vpop.f32.mrb[3].mxu1  ;;  %v1512_v32 = vld [vmem:[%s2616_s3 + $0x120] sm:$0xff] }
 0x2b4   : > { %v982_v36 = vadd.f32 %v981_v35, %v838_v24  ;;  %v1515_v35 = vld [vmem:[%s2616_s3 + $0x138] sm:$0xff] }
 0x2b5   : > { %2060 = vtanh.f32 %v987_v34  ;;  %v1514_v34 = vld [vmem:[%s2616_s3 + $0x130] sm:$0xff] }
 0x2b6   : > { %2062 = vtanh.f32 %v982_v36  ;;  %v1751_v37 = vpop.f32.mrb[4].mxu1  ;;  %v1516_v36 = vld [vmem:[%s2616_s3 + $0x140] sm:$0xff] }
 0x2b7   : > { %v997_v38 = vadd.f32 %v1751_v37, %v853_v25  ;;  %v991_v39 = vpop.f32.mrb[5].mxu1  ;;  %v1517_v37 = vld [vmem:[%s2616_s3 + $0x148] sm:$0xff] }
 0x2b8   : > { %v992_v41 = vadd.f32 %v991_v39, %v848_v26  ;;  %v1519_v39 = vld [vmem:[%s2616_s3 + $0x158] sm:$0xff] }
 0x2b9   : > { %2064 = vtanh.f32 %v997_v38  ;;  %v1518_v38 = vld [vmem:[%s2616_s3 + $0x150] sm:$0xff] }
 0x2ba   : > { %2066 = vtanh.f32 %v992_v41  ;;  %v1754_v43 = vpop.f32.mrb[6].mxu1  ;;  %v1521_v41 = vld [vmem:[%s2616_s3 + $0x168] sm:$0xff] }
 0x2bb   : > { %v2057_v44 = vpop.eup %2056  ;;  %v1007_v2 = vadd.f32 %v1754_v43, %v863_v31  ;;  %v1001_v45 = vpop.f32.mrb[7].mxu1  ;;  %v1511_v31 = vld [vmem:[%s2616_s3 + $0x118] sm:$0xff] }
 0x2bc   : > { %v2059_v46 = vpop.eup %2058  ;;  %v1002_v47 = vadd.f32 %v1001_v45, %v858_v33  ;;  %v1513_v33 = vld [vmem:[%s2616_s3 + $0x128] sm:$0xff]  ;;  %v1523_v43 = vld [vmem:[%s2616_s3 + $0x178] sm:$0xff]  ;;  %v1108_v45 = vpop.permute.xlu1 %1107 }
 0x2bd   : > { %2068 = vtanh.f32 %v1007_v2  ;;  %v1922_v48 = vpack.c.bf16 %v2057_v44, %v2059_v46  ;;  %v2129_v44 = vmov 0.0|0.0   ;;  %v2131_v2 = vmov 0.0   ;;  %v1103_v46 = vpop.permute.xlu0 %1102 }
 0x2be   : > { %2070 = vtanh.f32 %v1002_v47  ;;  %v1757_v50 = vpop.f32.mrb[8].mxu1  ;;  %1954 = vmatprep.subr.bf16.mxu1 %v2129_v44  ;;  %1855 = vmatprep.mubr.msk.f32.mxu1 %vm2130_vm0, %v2131_v2 }
 0x2bf   : > { %v2061_v51 = vpop.eup %2060  ;;  %v1017_v53 = vadd.f32 %v1757_v50, %v873_v40  ;;  %v1011_v54 = vpop.f32.mrb[9].mxu1  ;;  %1923 = vmatprep.subr.bf16.mxu0 %v1922_v48  ;;  %v1520_v40 = vld [vmem:[%s2616_s3 + $0x160] sm:$0xff] }
 0x2c0   : > { %v2063_v55 = vpop.eup %2062  ;;  %v1012_v56 = vadd.f32 %v1011_v54, %v868_v42  ;;  %1925 = vmatpush3.bf16.msra.mxu0 %v1922_v48  ;;  %v1522_v42 = vld [vmem:[%s2616_s3 + $0x170] sm:$0xff]  ;;  %v1118_v47 = vpop.permute.xlu1 %1117 }
 0x2c1   : > { %2072 = vtanh.f32 %v1017_v53  ;;  %v1926_v57 = vpack.c.bf16 %v2061_v51, %v2063_v55  ;;  %v1113_v48 = vpop.permute.xlu0 %1112 }
 0x2c2   : > { %2074 = vtanh.f32 %v1012_v56  ;;  %v1760_v58 = vpop.f32.mrb[10].mxu1 }
 0x2c3   : > { %v2065_v59 = vpop.eup %2064  ;;  %v1027_v60 = vadd.f32 %v1760_v58, %v883_v49  ;;  %v1021_v61 = vpop.f32.mrb[11].mxu1  ;;  %1927 = vmatprep.subr.bf16.mxu0 %v1926_v57 }
 0x2c4   : > { %v2067_v62 = vpop.eup %2066  ;;  %v1022_v0 = vadd.f32 %v1021_v61, %v878_v52  ;;  %1929 = vmatpush3.bf16.msra.mxu0 %v1926_v57  ;;  %v1128_v49 = vpop.permute.xlu1 %1127 }
 0x2c5   : > { %2076 = vtanh.f32 %v1027_v60  ;;  %v1930_v3 = vpack.c.bf16 %v2065_v59, %v2067_v62  ;;  %v1123_v50 = vpop.permute.xlu0 %1122 }
 0x2c6   : > { %2078 = vtanh.f32 %v1022_v0  ;;  %v1763_v4 = vpop.f32.mrb[12].mxu1 }
 0x2c7   : > { %v2069_v5 = vpop.eup %2068  ;;  %v1037_v6 = vadd.f32 %v1763_v4, %v893_v63  ;;  %v1031_v7 = vpop.f32.mrb[13].mxu1  ;;  %1931 = vmatprep.subr.bf16.mxu0 %v1930_v3 }
 0x2c8   : > { %v2071_v8 = vpop.eup %2070  ;;  %v1032_v9 = vadd.f32 %v1031_v7, %v888_v1  ;;  %1933 = vmatpush3.bf16.msra.mxu0 %v1930_v3  ;;  %v1138_v55 = vpop.permute.xlu1 %1137 }
 0x2c9   : > { %2080 = vtanh.f32 %v1037_v6  ;;  %v1934_v10 = vpack.c.bf16 %v2069_v5, %v2071_v8  ;;  %v1133_v57 = vpop.permute.xlu0 %1132 }
 0x2ca   : > { %2082 = vtanh.f32 %v1032_v9  ;;  %v1766_v12 = vpop.f32.mrb[14].mxu1 }
 0x2cb   : > { %v2073_v13 = vpop.eup %2072  ;;  %v1047_v15 = vadd.f32 %v1766_v12, %v903_v11  ;;  %v1041_v16 = vpop.f32.mrb[15].mxu1  ;;  %1935 = vmatprep.subr.bf16.mxu0 %v1934_v10 }
 0x2cc   : > { %v2075_v17 = vpop.eup %2074  ;;  %v1042_v18 = vadd.f32 %v1041_v16, %v898_v14  ;;  %1937 = vmatpush3.bf16.msra.mxu0 %v1934_v10  ;;  %v1148_v0 = vpop.permute.xlu1 %1147 }
 0x2cd   : > { %2084 = vtanh.f32 %v1047_v15  ;;  %v1938_v19 = vpack.c.bf16 %v2073_v13, %v2075_v17  ;;  %v1143_v3 = vpop.permute.xlu0 %1142 }
 0x2ce   : > { %2086 = vtanh.f32 %v1042_v18 }
 0x2cf   : > { %v2077_v20 = vpop.eup %2076  ;;  %1939 = vmatprep.subr.bf16.mxu0 %v1938_v19 }
 0x2d0   : > { %v2079_v21 = vpop.eup %2078  ;;  %1941 = vmatpush3.bf16.msra.mxu0 %v1938_v19  ;;  %v1158_v11 = vpop.permute.xlu1 %1157 }
 0x2d1   : > { %v1942_v22 = vpack.c.bf16 %v2077_v20, %v2079_v21  ;;  %v1153_v14 = vpop.permute.xlu0 %1152 }
 0x2d3   : > { %v2081_v23 = vpop.eup %2080  ;;  %1943 = vmatprep.subr.bf16.mxu0 %v1942_v22 }
 0x2d4   : > { %v2083_v24 = vpop.eup %2082  ;;  %1945 = vmatpush3.bf16.msra.mxu0 %v1942_v22 }
 0x2d5   : > { %v1946_v25 = vpack.c.bf16 %v2081_v23, %v2083_v24 }
 0x2d7   : > { %v2085_v26 = vpop.eup %2084  ;;  %1947 = vmatprep.subr.bf16.mxu0 %v1946_v25 }
 0x2d8   : > { %v2087_v27 = vpop.eup %2086  ;;  %1949 = vmatpush3.bf16.msra.mxu0 %v1946_v25  ;;  %v1168_v25 = vpop.permute.xlu1 %1167 }
 0x2d9   : > { %v1950_v28 = vpack.c.bf16 %v2085_v26, %v2087_v27  ;;  %v1163_v27 = vpop.permute.xlu0 %1162 }
 0x2db   : > { %1951 = vmatprep.subr.bf16.mxu0 %v1950_v28 }
 0x2dc   : > { %1953 = vmatpush3.bf16.msra.mxu0 %v1950_v28 }
 0x2df   : > { %1800 = vmatmul.mubr.f32.vlgmr.msra.gmra.mrb[16].mxu0 %v1509_v29 }
 0x2e0   : > { %1802 = vmatprep.mubr.f32.mxu0 %v1510_v30 }
 0x2e3   : > { %1803 = vmatmul.mubr.f32.gmra.mrb[18].mxu0 %v1511_v31 }
 0x2e4   : > { %1805 = vmatprep.mubr.f32.mxu0 %v1512_v32 }
 0x2e7   : > { %1806 = vmatmul.mubr.f32.gmra.mrb[20].mxu0 %v1513_v33 }
 0x2e8   : > { %1808 = vmatprep.mubr.f32.mxu0 %v1514_v34 }
 0x2eb   : > { %1809 = vmatmul.mubr.f32.gmra.mrb[22].mxu0 %v1515_v35 }
 0x2ec   : > { %1811 = vmatprep.mubr.f32.mxu0 %v1516_v36  ;;  %v1178_v36 = vpop.permute.xlu1 %1177 }
 0x2ef   : > { %1812 = vmatmul.mubr.f32.gmra.mrb[24].mxu0 %v1517_v37 }
 0x2f0   : > { %1814 = vmatprep.mubr.f32.mxu0 %v1518_v38 }
 0x2f3   : > { %1815 = vmatmul.mubr.f32.gmra.mrb[26].mxu0 %v1519_v39  ;;  %v1173_v39 = vpop.permute.xlu0 %1172 }
 0x2f4   : > { %1817 = vmatprep.mubr.f32.mxu0 %v1520_v40 }
 0x2f7   : > { %1818 = vmatmul.mubr.f32.gmra.mrb[28].mxu0 %v1521_v41 }
 0x2f8   : > { %1820 = vmatprep.mubr.f32.mxu0 %v1522_v42 }
 0x2fb   : > { %1821 = vmatmul.mubr.f32.gmra.mrb[30].mxu0 %v1523_v43 }
 0x3b2   : > { %v1801_v51 = vpop.f32.mrb[16].mxu0 }
 0x3b3   : > { %v1252_v52 = vadd.f32 %v1801_v51, %v1108_v45  ;;  %v1246_v53 = vpop.f32.mrb[17].mxu0 }
 0x3b4   : > { %v1247_v54 = vadd.f32 %v1246_v53, %v1103_v46 }
 0x3b5   : > { %2088 = vtanh.f32 %v1252_v52 }
 0x3b6   : > { %2090 = vtanh.f32 %v1247_v54  ;;  %v1804_v56 = vpop.f32.mrb[18].mxu0  ;;  %v1341_v54 = vld [vmem:[%s2618_s5] sm:$0xff] }
 0x3b7   : > { %v1262_v58 = vadd.f32 %v1804_v56, %v1118_v47  ;;  %v1256_v59 = vpop.f32.mrb[19].mxu0 }
 0x3b8   : > { %v1257_v60 = vadd.f32 %v1256_v59, %v1113_v48 }
 0x3b9   : > { %2092 = vtanh.f32 %v1262_v58 }
 0x3ba   : > { %2094 = vtanh.f32 %v1257_v60  ;;  %v1807_v61 = vpop.f32.mrb[20].mxu0 }
 0x3bb   : > { %v1272_v62 = vadd.f32 %v1807_v61, %v1128_v49  ;;  %v1266_v63 = vpop.f32.mrb[21].mxu0 }
 0x3bc   : > { %v1267_v1 = vadd.f32 %v1266_v63, %v1123_v50 }
 0x3bd   : > { %2096 = vtanh.f32 %v1272_v62 }
 0x3be   : > { %2098 = vtanh.f32 %v1267_v1  ;;  %v1810_v4 = vpop.f32.mrb[22].mxu0 }
 0x3bf   : > { %v2089_v5 = vpop.eup %2088  ;;  %v1282_v6 = vadd.f32 %v1810_v4, %v1138_v55  ;;  %v1276_v7 = vpop.f32.mrb[23].mxu0 }
 0x3c0   : > { %v2091_v8 = vpop.eup %2090  ;;  %v1277_v9 = vadd.f32 %v1276_v7, %v1133_v57  ;;  %v1346_v55 = vpop.permute.xlu0 %1345 }
 0x3c1   : > { %2100 = vtanh.f32 %v1282_v6  ;;  %v1955_v10 = vpack.c.bf16 %v2089_v5, %v2091_v8 }
 0x3c2   : > { %2102 = vtanh.f32 %v1277_v9  ;;  %v1813_v12 = vpop.f32.mrb[24].mxu0 }
 0x3c3   : > { %v2093_v13 = vpop.eup %2092  ;;  %v1292_v15 = vadd.f32 %v1813_v12, %v1148_v0  ;;  %v1286_v16 = vpop.f32.mrb[25].mxu0  ;;  %1956 = vmatpush3.bf16.msra.mxu1 %v1955_v10 }
 0x3c4   : > { %v2095_v17 = vpop.eup %2094  ;;  %v1287_v18 = vadd.f32 %v1286_v16, %v1143_v3  ;;  %1957 = vmatprep.subr.bf16.mxu1 %v2129_v44 }
 0x3c5   : > { %2104 = vtanh.f32 %v1292_v15  ;;  %v1958_v19 = vpack.c.bf16 %v2093_v13, %v2095_v17 }
 0x3c6   : > { %2106 = vtanh.f32 %v1287_v18  ;;  %v1816_v20 = vpop.f32.mrb[26].mxu0 }
 0x3c7   : > { %v2097_v21 = vpop.eup %2096  ;;  %v1302_v22 = vadd.f32 %v1816_v20, %v1158_v11  ;;  %v1296_v23 = vpop.f32.mrb[27].mxu0  ;;  %1959 = vmatpush3.bf16.msra.mxu1 %v1958_v19 }
 0x3c8   : > { %v2099_v24 = vpop.eup %2098  ;;  %v1297_v26 = vadd.f32 %v1296_v23, %v1153_v14  ;;  %1960 = vmatprep.subr.bf16.mxu1 %v2129_v44 }
 0x3c9   : > { %2108 = vtanh.f32 %v1302_v22  ;;  %v1961_v28 = vpack.c.bf16 %v2097_v21, %v2099_v24 }
 0x3ca   : > { %2110 = vtanh.f32 %v1297_v26  ;;  %v1819_v29 = vpop.f32.mrb[28].mxu0 }
 0x3cb   : > { %v2101_v30 = vpop.eup %2100  ;;  %v1312_v31 = vadd.f32 %v1819_v29, %v1168_v25  ;;  %v1306_v32 = vpop.f32.mrb[29].mxu0  ;;  %1962 = vmatpush3.bf16.msra.mxu1 %v1961_v28 }
 0x3cc   : > { %v2103_v33 = vpop.eup %2102  ;;  %v1307_v34 = vadd.f32 %v1306_v32, %v1163_v27  ;;  %1963 = vmatprep.subr.bf16.mxu1 %v2129_v44 }
 0x3cd   : > { %2112 = vtanh.f32 %v1312_v31  ;;  %v1964_v35 = vpack.c.bf16 %v2101_v30, %v2103_v33 }
 0x3ce   : > { %2114 = vtanh.f32 %v1307_v34  ;;  %v1822_v37 = vpop.f32.mrb[30].mxu0 }
 0x3cf   : > { %v2105_v38 = vpop.eup %2104  ;;  %v1322_v40 = vadd.f32 %v1822_v37, %v1178_v36  ;;  %v1316_v41 = vpop.f32.mrb[31].mxu0  ;;  %1965 = vmatpush3.bf16.msra.mxu1 %v1964_v35 }
 0x3d0   : > { %v2107_v42 = vpop.eup %2106  ;;  %v1317_v43 = vadd.f32 %v1316_v41, %v1173_v39  ;;  %1966 = vmatprep.subr.bf16.mxu1 %v2129_v44 }
 0x3d1   : > { %2116 = vtanh.f32 %v1322_v40  ;;  %v1967_v2 = vpack.c.bf16 %v2105_v38, %v2107_v42 }
 0x3d2   : > { %2118 = vtanh.f32 %v1317_v43 }
 0x3d3   : > { %v2109_v45 = vpop.eup %2108  ;;  %1968 = vmatpush3.bf16.msra.mxu1 %v1967_v2 }
 0x3d4   : > { %v2111_v46 = vpop.eup %2110  ;;  %1969 = vmatprep.subr.bf16.mxu1 %v2129_v44 }
 0x3d5   : > { %v1970_v47 = vpack.c.bf16 %v2109_v45, %v2111_v46 }
 0x3d7   : > { %v2113_v48 = vpop.eup %2112  ;;  %1971 = vmatpush3.bf16.msra.mxu1 %v1970_v47 }
 0x3d8   : > { %v2115_v49 = vpop.eup %2114  ;;  %1972 = vmatprep.subr.bf16.mxu1 %v2129_v44 }
 0x3d9   : > { %v1973_v50 = vpack.c.bf16 %v2113_v48, %v2115_v49 }
 0x3db   : > { %v2117_v51 = vpop.eup %2116  ;;  %1974 = vmatpush3.bf16.msra.mxu1 %v1973_v50 }
 0x3dc   : > { %v2119_v52 = vpop.eup %2118  ;;  %1975 = vmatprep.subr.bf16.mxu1 %v2129_v44 }
 0x3dd   : > { %v1976_v53 = vpack.c.bf16 %v2117_v51, %v2119_v52 }
 0x3df   : > { %1977 = vmatpush3.bf16.msra.mxu1 %v1976_v53 }
 0x3e2   : > { %1856 = vmatmul.mubr.f32.vlgmr.msra.gmra.mrb[16].mxu1 %v1341_v54 }
 0x4b5   : > { %v1414_v56 = vpop.f32.mrb[16].mxu1 }
 0x4b6   : > { %v1415_v57 = vadd.f32 %v1414_v56, %v1346_v55  ;;  %v1857_v58 = vpop.f32.mrb[17].mxu1 }
 0x4b8   : > { %1418 = vst [vmem:[%s270_s17] sm:$0xff] %v1415_v57 }
 0x4b9 PF: > { %s17_s24 = sadd.s32 1, %s2126_s24  }
 0x4ba   : > { %p14_p4 = scmp.ge.s32.totalorder %s17_s24, 4  }
 0x4bc   :  { %16 = sbr.rel (!%p14_p4) target bundleno = 1 (0x1), region = 82 }

</bundles_post_ra>
